<compile_context>
chip_gen: v5e
topology: v5e:2x2
jax: 0.10.0
libtpu: 0.0.40
codegen_flags: <defaults>
</compile_context>

<pallas_src>
import functools

import jax
import jax.numpy as jnp
import numpy as np
from jax.experimental import pallas as pl
from jax.experimental.pallas import tpu as pltpu


def _fape_kernel(*refs, z, clamp, num_masks):
    pR_ref, R_ref, pT_ref, T_ref, pTt_ref, Tt_ref = refs[:6]
    mask_refs = refs[6:6 + num_masks]
    out_ref = refs[6 + num_masks]

    jt = pl.program_id(1)

    @pl.when(jt == 0)
    def _init():
        out_ref[...] = jnp.zeros_like(out_ref)

    pR = pR_ref[0]     # [N, 9]  column c = 3*q + k  ->  predict_R[b, :, k, q]
    R = R_ref[0]       # [N, 9]  same packing for the target rotation
    pT = pT_ref[0]     # [N, 3]  predicted translations, residue i on sublanes
    T = T_ref[0]       # [N, 3]  target translations
    pTt = pTt_ref[0]   # [3, TJ] predicted translations, residue j on lanes (this tile)
    Tt = Tt_ref[0]     # [3, TJ] target translations

    # X_hat[i,j,q] - X[i,j,q]
    #   = sum_k pR[i,k,q]*(pT[j,k]-pT[i,k]) - sum_k R[i,k,q]*(T[j,k]-T[i,k])
    #   = [sum_k pR_qk[i]*pT_k[j] - R_qk[i]*T_k[j]]  -  [sum_k pR_qk[i]*pT_k[i] - R_qk[i]*T_k[i]]
    sq = None
    for q in range(3):            # unrolled over output coordinate q
        ab = None                 # (A_hat - A)[i, j]   -> [N, TJ]
        cc = None                 # (c_hat - c)[i]      -> [N, 1]
        for k in range(3):        # unrolled over contraction coordinate k
            c = 3 * q + k
            pr = pR[:, c:c + 1]                                   # [N, 1]
            rr = R[:, c:c + 1]                                    # [N, 1]
            term = pr * pTt[k:k + 1, :] - rr * Tt[k:k + 1, :]     # [N, TJ] (VPU broadcast)
            corr = pr * pT[:, k:k + 1] - rr * T[:, k:k + 1]       # [N, 1]
            ab = term if ab is None else ab + term
            cc = corr if cc is None else cc + corr
        d = ab - cc
        sq = d * d if sq is None else sq + d * d

    dist = jnp.sqrt(sq)                           # torch.norm(..., dim=-1)
    dist = jnp.minimum(dist, clamp) * (1.0 / z)   # clamp(max=clamp) * (1/Z)
    for m_ref in mask_refs:                       # in-kernel mask multiply, f32 upcast
        dist = dist * m_ref[0].astype(jnp.float32)

    out_ref[...] += jnp.sum(dist)                 # per-batch partial sum over this j tile


def _choose_j_tile(n, max_elems=512 * 1024):
    """Largest lane tile (multiple of 128 dividing n) keeping N*TJ bounded for VMEM."""
    if n * n <= max_elems or n % 128 != 0:
        return n
    best = 128                    # 128 always divides n here
    tj = 128
    while tj <= n:
        if n % tj == 0 and n * tj <= max_elems:
            best = tj
        tj += 128
    return best


def fape_loss_pallas(predict_R, predict_Trans, rotation, translation,
                     pdb_mask=None, padding_mask=None, Z=10.0, clamp=10.0):
    f32 = jnp.float32
    B, N = predict_Trans.shape[0], predict_Trans.shape[1]

    # O(B*N*9) repacks -- negligible HBM traffic.
    pR9 = jnp.transpose(predict_R.astype(f32), (0, 1, 3, 2)).reshape(B, N, 9)  # [B,N,9] (q,k)
    R9 = jnp.transpose(rotation.astype(f32), (0, 1, 3, 2)).reshape(B, N, 9)
    pT = predict_Trans.astype(f32)                                             # [B,N,3]
    T = translation.astype(f32)
    pTt = jnp.transpose(pT, (0, 2, 1))                                         # [B,3,N]
    Tt = jnp.transpose(T, (0, 2, 1))

    # Masks are passed through untouched (no wrapper combine / cast pass).
    masks = tuple(m for m in (pdb_mask, padding_mask) if m is not None)

    tj = _choose_j_tile(N)
    n_j = N // tj

    kernel = functools.partial(_fape_kernel, z=float(Z), clamp=float(clamp),
                               num_masks=len(masks))

    in_specs = [
        pl.BlockSpec((1, N, 9), lambda b, j: (b, 0, 0)),    # pR9   (constant over j)
        pl.BlockSpec((1, N, 9), lambda b, j: (b, 0, 0)),    # R9
        pl.BlockSpec((1, N, 3), lambda b, j: (b, 0, 0)),    # pT
        pl.BlockSpec((1, N, 3), lambda b, j: (b, 0, 0)),    # T
        pl.BlockSpec((1, 3, tj), lambda b, j: (b, 0, j)),   # pTt   (j tile)
        pl.BlockSpec((1, 3, tj), lambda b, j: (b, 0, j)),   # Tt
    ] + [pl.BlockSpec((1, N, tj), lambda b, j: (b, 0, j)) for _ in masks]

    grid_spec = pltpu.PrefetchScalarGridSpec(
        num_scalar_prefetch=0,
        grid=(B, n_j),
        in_specs=in_specs,
        out_specs=pl.BlockSpec((1, 1, 1), lambda b, j: (b, 0, 0)),  # per-batch partial
    )

    partials = pl.pallas_call(
        kernel,
        out_shape=jax.ShapeDtypeStruct((B, 1, 1), f32),
        grid_spec=grid_spec,
        compiler_params=pltpu.CompilerParams(
            dimension_semantics=("parallel", "arbitrary"),
            vmem_limit_bytes=48 * 1024 * 1024),
    )(pR9, R9, pT, T, pTt, Tt, *masks)

    return jnp.sum(partials) * (1.0 / float(B * N * N))


def fape_loss_ref(predict_R, predict_Trans, rotation, translation,
                  pdb_mask=None, padding_mask=None, Z=10.0, clamp=10.0):
    """Pure-JAX reference mirroring the PyTorch forward."""
    dpt = predict_Trans[:, :, None, :] - predict_Trans[:, None, :, :]   # [b, j, i, t]
    dt = translation[:, :, None, :] - translation[:, None, :, :]
    X_hat = jnp.einsum('bikq,bjik->bijq', predict_R, dpt)
    X = jnp.einsum('bikq,bjik->bijq', rotation, dt)
    dist = jnp.sqrt(jnp.sum((X_hat - X) ** 2, axis=-1))
    dist = jnp.minimum(dist, clamp) * (1.0 / Z)
    if pdb_mask is not None:
        dist = dist * pdb_mask
    if padding_mask is not None:
        dist = dist * padding_mask
    return jnp.mean(dist)


if __name__ == "__main__":
    B, N = 2, 8
    key = jax.random.PRNGKey(0)
    k1, k2, k3, k4, k5, k6 = jax.random.split(key, 6)

    predict_R = jax.random.normal(k1, (B, N, 3, 3), jnp.float32)
    predict_Trans = 3.0 * jax.random.normal(k2, (B, N, 3), jnp.float32)
    rotation = jax.random.normal(k3, (B, N, 3, 3), jnp.float32)
    translation = 3.0 * jax.random.normal(k4, (B, N, 3), jnp.float32)
    pdb_mask = (jax.random.uniform(k5, (B, N, N)) > 0.3).astype(jnp.float32)
    padding_mask = (jax.random.uniform(k6, (B, N, N)) > 0.2).astype(jnp.float32)

    loss = fape_loss_pallas(predict_R, predict_Trans, rotation, translation,
                            pdb_mask=pdb_mask, padding_mask=padding_mask)
    loss = jax.block_until_ready(loss)

    ref = fape_loss_ref(predict_R, predict_Trans, rotation, translation,
                        pdb_mask=pdb_mask, padding_mask=padding_mask)
    ref = jax.block_until_ready(ref)

    np.testing.assert_allclose(np.asarray(loss), np.asarray(ref), rtol=1e-4, atol=1e-5)

    # Also exercise the mask-free path once (different kernel specialization).
    loss_nm = jax.block_until_ready(
        fape_loss_pallas(predict_R, predict_Trans, rotation, translation))
    ref_nm = jax.block_until_ready(
        fape_loss_ref(predict_R, predict_Trans, rotation, translation))
    np.testing.assert_allclose(np.asarray(loss_nm), np.asarray(ref_nm),
                               rtol=1e-4, atol=1e-5)

    print("KERNEL_OK")
</pallas_src>

<mosaic_0001>
module attributes {stable_mosaic.version = 11 : i64} {
  func.func @_fape_kernel(%arg0: i32, %arg1: i32, %arg2: memref<1x8x9xf32, #tpu.memory_space<vmem>>, %arg3: memref<1x8x9xf32, #tpu.memory_space<vmem>>, %arg4: memref<1x8x3xf32, #tpu.memory_space<vmem>>, %arg5: memref<1x8x3xf32, #tpu.memory_space<vmem>>, %arg6: memref<1x3x8xf32, #tpu.memory_space<vmem>>, %arg7: memref<1x3x8xf32, #tpu.memory_space<vmem>>, %arg8: memref<1x8x8xf32, #tpu.memory_space<vmem>>, %arg9: memref<1x8x8xf32, #tpu.memory_space<vmem>>, %arg10: memref<1x1x1xf32, #tpu.memory_space<vmem>>) attributes {dimension_semantics = [#tpu.dimension_semantics<parallel>, #tpu.dimension_semantics<arbitrary>], iteration_bounds = array<i64: 2, 1>, scalar_prefetch = 0 : i64, scratch_operands = 0 : i64, tpu.core_type = #tpu.core_type<tc>, window_params = [{transform_indices = @transform_0, window_bounds = array<i64: 1, 8, 9>}, {transform_indices = @transform_1, window_bounds = array<i64: 1, 8, 9>}, {transform_indices = @transform_2, window_bounds = array<i64: 1, 8, 3>}, {transform_indices = @transform_3, window_bounds = array<i64: 1, 8, 3>}, {transform_indices = @transform_4, window_bounds = array<i64: 1, 3, 8>}, {transform_indices = @transform_5, window_bounds = array<i64: 1, 3, 8>}, {transform_indices = @transform_6, window_bounds = array<i64: 1, 8, 8>}, {transform_indices = @transform_7, window_bounds = array<i64: 1, 8, 8>}, {transform_indices = @transform_8, window_bounds = array<i64: 1, 1, 1>}]} {
    %c0_i32 = arith.constant 0 : i32
    %0 = arith.cmpi eq, %arg1, %c0_i32 : i32
    %1 = arith.extui %0 : i1 to i32
    %c0_i32_0 = arith.constant 0 : i32
    %2 = arith.cmpi ne, %1, %c0_i32_0 : i32
    scf.if %2 {
      %cst_32 = arith.constant 0.000000e+00 : f32
      %201 = vector.broadcast %cst_32 : f32 to vector<1x1x1xf32>
      %c0_33 = arith.constant 0 : index
      %c0_34 = arith.constant 0 : index
      %c0_35 = arith.constant 0 : index
      %202 = vector.load %arg10[%c0_33, %c0_34, %c0_35] : memref<1x1x1xf32, #tpu.memory_space<vmem>>, vector<1x1x1xf32>
      tpu.vector_store %arg10[%c0_33, %c0_34, %c0_35], %201 {strides = array<i32>} : memref<1x1x1xf32, #tpu.memory_space<vmem>>, vector<1x1x1xf32>,
    } else {
    }
    %c0 = arith.constant 0 : index
    %c0_1 = arith.constant 0 : index
    %c0_2 = arith.constant 0 : index
    %3 = vector.load %arg2[%c0, %c0_1, %c0_2] : memref<1x8x9xf32, #tpu.memory_space<vmem>>, vector<1x8x9xf32>
    %4 = vector.shape_cast %3 : vector<1x8x9xf32> to vector<8x9xf32>
    %c0_3 = arith.constant 0 : index
    %c0_4 = arith.constant 0 : index
    %c0_5 = arith.constant 0 : index
    %5 = vector.load %arg3[%c0_3, %c0_4, %c0_5] : memref<1x8x9xf32, #tpu.memory_space<vmem>>, vector<1x8x9xf32>
    %6 = vector.shape_cast %5 : vector<1x8x9xf32> to vector<8x9xf32>
    %c0_6 = arith.constant 0 : index
    %c0_7 = arith.constant 0 : index
    %c0_8 = arith.constant 0 : index
    %7 = vector.load %arg4[%c0_6, %c0_7, %c0_8] : memref<1x8x3xf32, #tpu.memory_space<vmem>>, vector<1x8x3xf32>
    %8 = vector.shape_cast %7 : vector<1x8x3xf32> to vector<8x3xf32>
    %c0_9 = arith.constant 0 : index
    %c0_10 = arith.constant 0 : index
    %c0_11 = arith.constant 0 : index
    %9 = vector.load %arg5[%c0_9, %c0_10, %c0_11] : memref<1x8x3xf32, #tpu.memory_space<vmem>>, vector<1x8x3xf32>
    %10 = vector.shape_cast %9 : vector<1x8x3xf32> to vector<8x3xf32>
    %c0_12 = arith.constant 0 : index
    %c0_13 = arith.constant 0 : index
    %c0_14 = arith.constant 0 : index
    %11 = vector.load %arg6[%c0_12, %c0_13, %c0_14] : memref<1x3x8xf32, #tpu.memory_space<vmem>>, vector<1x3x8xf32>
    %12 = vector.shape_cast %11 : vector<1x3x8xf32> to vector<3x8xf32>
    %c0_15 = arith.constant 0 : index
    %c0_16 = arith.constant 0 : index
    %c0_17 = arith.constant 0 : index
    %13 = vector.load %arg7[%c0_15, %c0_16, %c0_17] : memref<1x3x8xf32, #tpu.memory_space<vmem>>, vector<1x3x8xf32>
    %14 = vector.shape_cast %13 : vector<1x3x8xf32> to vector<3x8xf32>
    %15 = vector.extract_strided_slice %4 {offsets = [0, 0], sizes = [8, 1], strides = [1, 1]} : vector<8x9xf32> to vector<8x1xf32>
    %16 = vector.extract_strided_slice %6 {offsets = [0, 0], sizes = [8, 1], strides = [1, 1]} : vector<8x9xf32> to vector<8x1xf32>
    %17 = vector.extract_strided_slice %12 {offsets = [0, 0], sizes = [1, 8], strides = [1, 1]} : vector<3x8xf32> to vector<1x8xf32>
    %18 = vector.broadcast %15 : vector<8x1xf32> to vector<8x8xf32>
    %19 = vector.broadcast %17 : vector<1x8xf32> to vector<8x8xf32>
    %20 = arith.mulf %18, %19 : vector<8x8xf32>
    %21 = vector.extract_strided_slice %14 {offsets = [0, 0], sizes = [1, 8], strides = [1, 1]} : vector<3x8xf32> to vector<1x8xf32>
    %22 = vector.broadcast %16 : vector<8x1xf32> to vector<8x8xf32>
    %23 = vector.broadcast %21 : vector<1x8xf32> to vector<8x8xf32>
    %24 = arith.mulf %22, %23 : vector<8x8xf32>
    %25 = arith.subf %20, %24 : vector<8x8xf32>
    %26 = vector.extract_strided_slice %8 {offsets = [0, 0], sizes = [8, 1], strides = [1, 1]} : vector<8x3xf32> to vector<8x1xf32>
    %27 = arith.mulf %15, %26 : vector<8x1xf32>
    %28 = vector.extract_strided_slice %10 {offsets = [0, 0], sizes = [8, 1], strides = [1, 1]} : vector<8x3xf32> to vector<8x1xf32>
    %29 = arith.mulf %16, %28 : vector<8x1xf32>
    %30 = arith.subf %27, %29 : vector<8x1xf32>
    %31 = vector.extract_strided_slice %4 {offsets = [0, 1], sizes = [8, 1], strides = [1, 1]} : vector<8x9xf32> to vector<8x1xf32>
    %32 = vector.extract_strided_slice %6 {offsets = [0, 1], sizes = [8, 1], strides = [1, 1]} : vector<8x9xf32> to vector<8x1xf32>
    %33 = vector.extract_strided_slice %12 {offsets = [1, 0], sizes = [1, 8], strides = [1, 1]} : vector<3x8xf32> to vector<1x8xf32>
    %34 = vector.broadcast %31 : vector<8x1xf32> to vector<8x8xf32>
    %35 = vector.broadcast %33 : vector<1x8xf32> to vector<8x8xf32>
    %36 = arith.mulf %34, %35 : vector<8x8xf32>
    %37 = vector.extract_strided_slice %14 {offsets = [1, 0], sizes = [1, 8], strides = [1, 1]} : vector<3x8xf32> to vector<1x8xf32>
    %38 = vector.broadcast %32 : vector<8x1xf32> to vector<8x8xf32>
    %39 = vector.broadcast %37 : vector<1x8xf32> to vector<8x8xf32>
    %40 = arith.mulf %38, %39 : vector<8x8xf32>
    %41 = arith.subf %36, %40 : vector<8x8xf32>
    %42 = vector.extract_strided_slice %8 {offsets = [0, 1], sizes = [8, 1], strides = [1, 1]} : vector<8x3xf32> to vector<8x1xf32>
    %43 = arith.mulf %31, %42 : vector<8x1xf32>
    %44 = vector.extract_strided_slice %10 {offsets = [0, 1], sizes = [8, 1], strides = [1, 1]} : vector<8x3xf32> to vector<8x1xf32>
    %45 = arith.mulf %32, %44 : vector<8x1xf32>
    %46 = arith.subf %43, %45 : vector<8x1xf32>
    %47 = arith.addf %25, %41 : vector<8x8xf32>
    %48 = arith.addf %30, %46 : vector<8x1xf32>
    %49 = vector.extract_strided_slice %4 {offsets = [0, 2], sizes = [8, 1], strides = [1, 1]} : vector<8x9xf32> to vector<8x1xf32>
    %50 = vector.extract_strided_slice %6 {offsets = [0, 2], sizes = [8, 1], strides = [1, 1]} : vector<8x9xf32> to vector<8x1xf32>
    %51 = vector.extract_strided_slice %12 {offsets = [2, 0], sizes = [1, 8], strides = [1, 1]} : vector<3x8xf32> to vector<1x8xf32>
    %52 = vector.broadcast %49 : vector<8x1xf32> to vector<8x8xf32>
    %53 = vector.broadcast %51 : vector<1x8xf32> to vector<8x8xf32>
    %54 = arith.mulf %52, %53 : vector<8x8xf32>
    %55 = vector.extract_strided_slice %14 {offsets = [2, 0], sizes = [1, 8], strides = [1, 1]} : vector<3x8xf32> to vector<1x8xf32>
    %56 = vector.broadcast %50 : vector<8x1xf32> to vector<8x8xf32>
    %57 = vector.broadcast %55 : vector<1x8xf32> to vector<8x8xf32>
    %58 = arith.mulf %56, %57 : vector<8x8xf32>
    %59 = arith.subf %54, %58 : vector<8x8xf32>
    %60 = vector.extract_strided_slice %8 {offsets = [0, 2], sizes = [8, 1], strides = [1, 1]} : vector<8x3xf32> to vector<8x1xf32>
    %61 = arith.mulf %49, %60 : vector<8x1xf32>
    %62 = vector.extract_strided_slice %10 {offsets = [0, 2], sizes = [8, 1], strides = [1, 1]} : vector<8x3xf32> to vector<8x1xf32>
    %63 = arith.mulf %50, %62 : vector<8x1xf32>
    %64 = arith.subf %61, %63 : vector<8x1xf32>
    %65 = arith.addf %47, %59 : vector<8x8xf32>
    %66 = arith.addf %48, %64 : vector<8x1xf32>
    %67 = vector.broadcast %66 : vector<8x1xf32> to vector<8x8xf32>
    %68 = arith.subf %65, %67 : vector<8x8xf32>
    %69 = arith.mulf %68, %68 : vector<8x8xf32>
    %70 = vector.extract_strided_slice %4 {offsets = [0, 3], sizes = [8, 1], strides = [1, 1]} : vector<8x9xf32> to vector<8x1xf32>
    %71 = vector.extract_strided_slice %6 {offsets = [0, 3], sizes = [8, 1], strides = [1, 1]} : vector<8x9xf32> to vector<8x1xf32>
    %72 = vector.extract_strided_slice %12 {offsets = [0, 0], sizes = [1, 8], strides = [1, 1]} : vector<3x8xf32> to vector<1x8xf32>
    %73 = vector.broadcast %70 : vector<8x1xf32> to vector<8x8xf32>
    %74 = vector.broadcast %72 : vector<1x8xf32> to vector<8x8xf32>
    %75 = arith.mulf %73, %74 : vector<8x8xf32>
    %76 = vector.extract_strided_slice %14 {offsets = [0, 0], sizes = [1, 8], strides = [1, 1]} : vector<3x8xf32> to vector<1x8xf32>
    %77 = vector.broadcast %71 : vector<8x1xf32> to vector<8x8xf32>
    %78 = vector.broadcast %76 : vector<1x8xf32> to vector<8x8xf32>
    %79 = arith.mulf %77, %78 : vector<8x8xf32>
    %80 = arith.subf %75, %79 : vector<8x8xf32>
    %81 = vector.extract_strided_slice %8 {offsets = [0, 0], sizes = [8, 1], strides = [1, 1]} : vector<8x3xf32> to vector<8x1xf32>
    %82 = arith.mulf %70, %81 : vector<8x1xf32>
    %83 = vector.extract_strided_slice %10 {offsets = [0, 0], sizes = [8, 1], strides = [1, 1]} : vector<8x3xf32> to vector<8x1xf32>
    %84 = arith.mulf %71, %83 : vector<8x1xf32>
    %85 = arith.subf %82, %84 : vector<8x1xf32>
    %86 = vector.extract_strided_slice %4 {offsets = [0, 4], sizes = [8, 1], strides = [1, 1]} : vector<8x9xf32> to vector<8x1xf32>
    %87 = vector.extract_strided_slice %6 {offsets = [0, 4], sizes = [8, 1], strides = [1, 1]} : vector<8x9xf32> to vector<8x1xf32>
    %88 = vector.extract_strided_slice %12 {offsets = [1, 0], sizes = [1, 8], strides = [1, 1]} : vector<3x8xf32> to vector<1x8xf32>
    %89 = vector.broadcast %86 : vector<8x1xf32> to vector<8x8xf32>
    %90 = vector.broadcast %88 : vector<1x8xf32> to vector<8x8xf32>
    %91 = arith.mulf %89, %90 : vector<8x8xf32>
    %92 = vector.extract_strided_slice %14 {offsets = [1, 0], sizes = [1, 8], strides = [1, 1]} : vector<3x8xf32> to vector<1x8xf32>
    %93 = vector.broadcast %87 : vector<8x1xf32> to vector<8x8xf32>
    %94 = vector.broadcast %92 : vector<1x8xf32> to vector<8x8xf32>
    %95 = arith.mulf %93, %94 : vector<8x8xf32>
    %96 = arith.subf %91, %95 : vector<8x8xf32>
    %97 = vector.extract_strided_slice %8 {offsets = [0, 1], sizes = [8, 1], strides = [1, 1]} : vector<8x3xf32> to vector<8x1xf32>
    %98 = arith.mulf %86, %97 : vector<8x1xf32>
    %99 = vector.extract_strided_slice %10 {offsets = [0, 1], sizes = [8, 1], strides = [1, 1]} : vector<8x3xf32> to vector<8x1xf32>
    %100 = arith.mulf %87, %99 : vector<8x1xf32>
    %101 = arith.subf %98, %100 : vector<8x1xf32>
    %102 = arith.addf %80, %96 : vector<8x8xf32>
    %103 = arith.addf %85, %101 : vector<8x1xf32>
    %104 = vector.extract_strided_slice %4 {offsets = [0, 5], sizes = [8, 1], strides = [1, 1]} : vector<8x9xf32> to vector<8x1xf32>
    %105 = vector.extract_strided_slice %6 {offsets = [0, 5], sizes = [8, 1], strides = [1, 1]} : vector<8x9xf32> to vector<8x1xf32>
    %106 = vector.extract_strided_slice %12 {offsets = [2, 0], sizes = [1, 8], strides = [1, 1]} : vector<3x8xf32> to vector<1x8xf32>
    %107 = vector.broadcast %104 : vector<8x1xf32> to vector<8x8xf32>
    %108 = vector.broadcast %106 : vector<1x8xf32> to vector<8x8xf32>
    %109 = arith.mulf %107, %108 : vector<8x8xf32>
    %110 = vector.extract_strided_slice %14 {offsets = [2, 0], sizes = [1, 8], strides = [1, 1]} : vector<3x8xf32> to vector<1x8xf32>
    %111 = vector.broadcast %105 : vector<8x1xf32> to vector<8x8xf32>
    %112 = vector.broadcast %110 : vector<1x8xf32> to vector<8x8xf32>
    %113 = arith.mulf %111, %112 : vector<8x8xf32>
    %114 = arith.subf %109, %113 : vector<8x8xf32>
    %115 = vector.extract_strided_slice %8 {offsets = [0, 2], sizes = [8, 1], strides = [1, 1]} : vector<8x3xf32> to vector<8x1xf32>
    %116 = arith.mulf %104, %115 : vector<8x1xf32>
    %117 = vector.extract_strided_slice %10 {offsets = [0, 2], sizes = [8, 1], strides = [1, 1]} : vector<8x3xf32> to vector<8x1xf32>
    %118 = arith.mulf %105, %117 : vector<8x1xf32>
    %119 = arith.subf %116, %118 : vector<8x1xf32>
    %120 = arith.addf %102, %114 : vector<8x8xf32>
    %121 = arith.addf %103, %119 : vector<8x1xf32>
    %122 = vector.broadcast %121 : vector<8x1xf32> to vector<8x8xf32>
    %123 = arith.subf %120, %122 : vector<8x8xf32>
    %124 = arith.mulf %123, %123 : vector<8x8xf32>
    %125 = arith.addf %69, %124 : vector<8x8xf32>
    %126 = vector.extract_strided_slice %4 {offsets = [0, 6], sizes = [8, 1], strides = [1, 1]} : vector<8x9xf32> to vector<8x1xf32>
    %127 = vector.extract_strided_slice %6 {offsets = [0, 6], sizes = [8, 1], strides = [1, 1]} : vector<8x9xf32> to vector<8x1xf32>
    %128 = vector.extract_strided_slice %12 {offsets = [0, 0], sizes = [1, 8], strides = [1, 1]} : vector<3x8xf32> to vector<1x8xf32>
    %129 = vector.broadcast %126 : vector<8x1xf32> to vector<8x8xf32>
    %130 = vector.broadcast %128 : vector<1x8xf32> to vector<8x8xf32>
    %131 = arith.mulf %129, %130 : vector<8x8xf32>
    %132 = vector.extract_strided_slice %14 {offsets = [0, 0], sizes = [1, 8], strides = [1, 1]} : vector<3x8xf32> to vector<1x8xf32>
    %133 = vector.broadcast %127 : vector<8x1xf32> to vector<8x8xf32>
    %134 = vector.broadcast %132 : vector<1x8xf32> to vector<8x8xf32>
    %135 = arith.mulf %133, %134 : vector<8x8xf32>
    %136 = arith.subf %131, %135 : vector<8x8xf32>
    %137 = vector.extract_strided_slice %8 {offsets = [0, 0], sizes = [8, 1], strides = [1, 1]} : vector<8x3xf32> to vector<8x1xf32>
    %138 = arith.mulf %126, %137 : vector<8x1xf32>
    %139 = vector.extract_strided_slice %10 {offsets = [0, 0], sizes = [8, 1], strides = [1, 1]} : vector<8x3xf32> to vector<8x1xf32>
    %140 = arith.mulf %127, %139 : vector<8x1xf32>
    %141 = arith.subf %138, %140 : vector<8x1xf32>
    %142 = vector.extract_strided_slice %4 {offsets = [0, 7], sizes = [8, 1], strides = [1, 1]} : vector<8x9xf32> to vector<8x1xf32>
    %143 = vector.extract_strided_slice %6 {offsets = [0, 7], sizes = [8, 1], strides = [1, 1]} : vector<8x9xf32> to vector<8x1xf32>
    %144 = vector.extract_strided_slice %12 {offsets = [1, 0], sizes = [1, 8], strides = [1, 1]} : vector<3x8xf32> to vector<1x8xf32>
    %145 = vector.broadcast %142 : vector<8x1xf32> to vector<8x8xf32>
    %146 = vector.broadcast %144 : vector<1x8xf32> to vector<8x8xf32>
    %147 = arith.mulf %145, %146 : vector<8x8xf32>
    %148 = vector.extract_strided_slice %14 {offsets = [1, 0], sizes = [1, 8], strides = [1, 1]} : vector<3x8xf32> to vector<1x8xf32>
    %149 = vector.broadcast %143 : vector<8x1xf32> to vector<8x8xf32>
    %150 = vector.broadcast %148 : vector<1x8xf32> to vector<8x8xf32>
    %151 = arith.mulf %149, %150 : vector<8x8xf32>
    %152 = arith.subf %147, %151 : vector<8x8xf32>
    %153 = vector.extract_strided_slice %8 {offsets = [0, 1], sizes = [8, 1], strides = [1, 1]} : vector<8x3xf32> to vector<8x1xf32>
    %154 = arith.mulf %142, %153 : vector<8x1xf32>
    %155 = vector.extract_strided_slice %10 {offsets = [0, 1], sizes = [8, 1], strides = [1, 1]} : vector<8x3xf32> to vector<8x1xf32>
    %156 = arith.mulf %143, %155 : vector<8x1xf32>
    %157 = arith.subf %154, %156 : vector<8x1xf32>
    %158 = arith.addf %136, %152 : vector<8x8xf32>
    %159 = arith.addf %141, %157 : vector<8x1xf32>
    %160 = vector.extract_strided_slice %4 {offsets = [0, 8], sizes = [8, 1], strides = [1, 1]} : vector<8x9xf32> to vector<8x1xf32>
    %161 = vector.extract_strided_slice %6 {offsets = [0, 8], sizes = [8, 1], strides = [1, 1]} : vector<8x9xf32> to vector<8x1xf32>
    %162 = vector.extract_strided_slice %12 {offsets = [2, 0], sizes = [1, 8], strides = [1, 1]} : vector<3x8xf32> to vector<1x8xf32>
    %163 = vector.broadcast %160 : vector<8x1xf32> to vector<8x8xf32>
    %164 = vector.broadcast %162 : vector<1x8xf32> to vector<8x8xf32>
    %165 = arith.mulf %163, %164 : vector<8x8xf32>
    %166 = vector.extract_strided_slice %14 {offsets = [2, 0], sizes = [1, 8], strides = [1, 1]} : vector<3x8xf32> to vector<1x8xf32>
    %167 = vector.broadcast %161 : vector<8x1xf32> to vector<8x8xf32>
    %168 = vector.broadcast %166 : vector<1x8xf32> to vector<8x8xf32>
    %169 = arith.mulf %167, %168 : vector<8x8xf32>
    %170 = arith.subf %165, %169 : vector<8x8xf32>
    %171 = vector.extract_strided_slice %8 {offsets = [0, 2], sizes = [8, 1], strides = [1, 1]} : vector<8x3xf32> to vector<8x1xf32>
    %172 = arith.mulf %160, %171 : vector<8x1xf32>
    %173 = vector.extract_strided_slice %10 {offsets = [0, 2], sizes = [8, 1], strides = [1, 1]} : vector<8x3xf32> to vector<8x1xf32>
    %174 = arith.mulf %161, %173 : vector<8x1xf32>
    %175 = arith.subf %172, %174 : vector<8x1xf32>
    %176 = arith.addf %158, %170 : vector<8x8xf32>
    %177 = arith.addf %159, %175 : vector<8x1xf32>
    %178 = vector.broadcast %177 : vector<8x1xf32> to vector<8x8xf32>
    %179 = arith.subf %176, %178 : vector<8x8xf32>
    %180 = arith.mulf %179, %179 : vector<8x8xf32>
    %181 = arith.addf %125, %180 : vector<8x8xf32>
    %182 = math.sqrt %181 : vector<8x8xf32>
    %cst = arith.constant 1.000000e+01 : f32
    %183 = vector.broadcast %cst : f32 to vector<8x8xf32>
    %184 = arith.minimumf %182, %183 : vector<8x8xf32>
    %cst_18 = arith.constant 1.000000e-01 : f32
    %185 = vector.broadcast %cst_18 : f32 to vector<8x8xf32>
    %186 = arith.mulf %184, %185 : vector<8x8xf32>
    %c0_19 = arith.constant 0 : index
    %c0_20 = arith.constant 0 : index
    %c0_21 = arith.constant 0 : index
    %187 = vector.load %arg8[%c0_19, %c0_20, %c0_21] : memref<1x8x8xf32, #tpu.memory_space<vmem>>, vector<1x8x8xf32>
    %188 = vector.shape_cast %187 : vector<1x8x8xf32> to vector<8x8xf32>
    %189 = arith.mulf %186, %188 : vector<8x8xf32>
    %c0_22 = arith.constant 0 : index
    %c0_23 = arith.constant 0 : index
    %c0_24 = arith.constant 0 : index
    %190 = vector.load %arg9[%c0_22, %c0_23, %c0_24] : memref<1x8x8xf32, #tpu.memory_space<vmem>>, vector<1x8x8xf32>
    %191 = vector.shape_cast %190 : vector<1x8x8xf32> to vector<8x8xf32>
    %192 = arith.mulf %189, %191 : vector<8x8xf32>
    %c0_25 = arith.constant 0 : index
    %c0_26 = arith.constant 0 : index
    %c0_27 = arith.constant 0 : index
    %193 = vector.load %arg10[%c0_25, %c0_26, %c0_27] : memref<1x1x1xf32, #tpu.memory_space<vmem>>, vector<1x1x1xf32>
    %194 = vector.shape_cast %192 : vector<8x8xf32> to vector<1x8x8xf32>
    %cst_28 = arith.constant dense<0.000000e+00> : vector<1xf32>
    %195 = vector.multi_reduction <add>, %194, %cst_28 [1, 2] : vector<1x8x8xf32> to vector<1xf32>
    %196 = vector.shape_cast %195 : vector<1xf32> to vector<1x1x1xf32>
    %197 = vector.extract %196[0, 0, 0] : f32 from vector<1x1x1xf32>
    %198 = vector.broadcast %197 : f32 to vector<1x1x1xf32>
    %199 = arith.addf %193, %198 : vector<1x1x1xf32>
    %c0_29 = arith.constant 0 : index
    %c0_30 = arith.constant 0 : index
    %c0_31 = arith.constant 0 : index
    %200 = vector.load %arg10[%c0_29, %c0_30, %c0_31] : memref<1x1x1xf32, #tpu.memory_space<vmem>>, vector<1x1x1xf32>
    tpu.vector_store %arg10[%c0_29, %c0_30, %c0_31], %199 {strides = array<i32>} : memref<1x1x1xf32, #tpu.memory_space<vmem>>, vector<1x1x1xf32>,
    return
  }
  func.func @transform_0(%arg0: i32, %arg1: i32) -> (i32, i32, i32) {
    %c0_i32 = arith.constant 0 : i32
    %c0_i32_0 = arith.constant 0 : i32
    %c0_i32_1 = arith.constant 0 : i32
    return %arg0, %c0_i32, %c0_i32_0 : i32, i32, i32
  }
  func.func @transform_1(%arg0: i32, %arg1: i32) -> (i32, i32, i32) {
    %c0_i32 = arith.constant 0 : i32
    %c0_i32_0 = arith.constant 0 : i32
    %c0_i32_1 = arith.constant 0 : i32
    return %arg0, %c0_i32, %c0_i32_0 : i32, i32, i32
  }
  func.func @transform_2(%arg0: i32, %arg1: i32) -> (i32, i32, i32) {
    %c0_i32 = arith.constant 0 : i32
    %c0_i32_0 = arith.constant 0 : i32
    %c0_i32_1 = arith.constant 0 : i32
    return %arg0, %c0_i32, %c0_i32_0 : i32, i32, i32
  }
  func.func @transform_3(%arg0: i32, %arg1: i32) -> (i32, i32, i32) {
    %c0_i32 = arith.constant 0 : i32
    %c0_i32_0 = arith.constant 0 : i32
    %c0_i32_1 = arith.constant 0 : i32
    return %arg0, %c0_i32, %c0_i32_0 : i32, i32, i32
  }
  func.func @transform_4(%arg0: i32, %arg1: i32) -> (i32, i32, i32) {
    %c0_i32 = arith.constant 0 : i32
    %c0_i32_0 = arith.constant 0 : i32
    return %arg0, %c0_i32, %arg1 : i32, i32, i32
  }
  func.func @transform_5(%arg0: i32, %arg1: i32) -> (i32, i32, i32) {
    %c0_i32 = arith.constant 0 : i32
    %c0_i32_0 = arith.constant 0 : i32
    return %arg0, %c0_i32, %arg1 : i32, i32, i32
  }
  func.func @transform_6(%arg0: i32, %arg1: i32) -> (i32, i32, i32) {
    %c0_i32 = arith.constant 0 : i32
    %c0_i32_0 = arith.constant 0 : i32
    return %arg0, %c0_i32, %arg1 : i32, i32, i32
  }
  func.func @transform_7(%arg0: i32, %arg1: i32) -> (i32, i32, i32) {
    %c0_i32 = arith.constant 0 : i32
    %c0_i32_0 = arith.constant 0 : i32
    return %arg0, %c0_i32, %arg1 : i32, i32, i32
  }
  func.func @transform_8(%arg0: i32, %arg1: i32) -> (i32, i32, i32) {
    %c0_i32 = arith.constant 0 : i32
    %c0_i32_0 = arith.constant 0 : i32
    %c0_i32_1 = arith.constant 0 : i32
    return %arg0, %c0_i32, %c0_i32_0 : i32, i32, i32
  }
}

</mosaic_0001>

<bundles_post_ra>
// kernel: tpu_custom_call.1
= control target key start
LH: loop header
LB: loop body
LE: loop exit
PB: predicated region body
PF: predicated region fallthrough
CT: control target
= control target key end

     0   :  { %13 = vsyncpa [#allocation3], 0  ;;  %s1342_s0 = inlined_call_operand.vmem [shape: f32[2,8,9], index: 0, kind: input, shape index: {}]   ;;  %s1343_s1 = inlined_call_operand.vmem [shape: f32[2,8,9], index: 1, kind: input, shape index: {}]   ;;  %s1344_s2 = inlined_call_operand.vmem [shape: f32[2,8,3], index: 2, kind: input, shape index: {}]   ;;  %s1345_s3 = inlined_call_operand.vmem [shape: f32[2,8,3], index: 3, kind: input, shape index: {}]   ;;  %s1346_s4 = inlined_call_operand.vmem [shape: f32[2,3,8], index: 4, kind: input, shape index: {}]   ;;  %s1347_s5 = inlined_call_operand.vmem [shape: f32[2,3,8], index: 5, kind: input, shape index: {}]   ;;  %s1348_s6 = inlined_call_operand.vmem [shape: f32[2,8,8], index: 6, kind: input, shape index: {}]   ;;  %s1349_s7 = inlined_call_operand.hbm [shape: f32[2,8,8], index: 7, kind: input, shape index: {}]   ;;  %s1350_s8 = inlined_call_operand.vmem [shape: f32[2,1,1], index: 8, kind: output, shape index: {}]  }
   0x1   :  { %15 = vsyncpa [#allocation3 + $0x1], 0  ;;  %s1134_s27 = smov 0   ;;  %s1136_s28 = smov 0  }
   0x2   :  { %s1138_s29 = smov 0   ;;  %s1140_s30 = smov 0  }
   0x3   :  { %s1142_s9 = smov 0   ;;  %s1144_s10 = smov 0  }
   0x4 LB: > { %s881_s11 = sadd.s32 4294967295, %s1073_s10   ;;  %s33_s12 = sadd.s32 1, %s1069_s9  ;;  %s1073_s10 = sphi %s1144_s10, %s21_s10   ;;  %s1069_s9 = sphi %s1142_s9, %s1357_s9   ;;  %s1065_s30 = sphi %s1140_s30, %s1356_s30   ;;  %s1061_s29 = sphi %s1138_s29, %s1355_s29   ;;  %s1057_s28 = sphi %s1136_s28, %s1354_s28   ;;  %s1053_s27 = sphi %s1134_s27, %s1353_s27  }
   0x5   : > { %p35_p0 = scmp.ge.s32.totalorder %s33_s12, 2  ;;  %s230_s13 = sadd.s32 1, %s1061_s29 }
   0x6   : > { %p237_p1 = scmp.ne.s32.totalorder %s1061_s29, %s1057_s28  ;;  %p238_p2 = scmp.eq.s32.totalorder %s1073_s10, 0 }
   0x7   : > { %s1359_s12 = smov (%p35_p0, %s33_s12), 0  ;;  %p243_p4 = scmp.ne.s32.totalorder %s1057_s28, %s1053_s27 }
   0x8   : > { %p1170_p3 = por %p238_p2, %p237_p1  ;;  %s225_s15 = ssub.s32 %s1069_s9, %s1359_s12 }
   0x9   : > { %p244_p5 = scmp.eq.s32.totalorder %s881_s11, 0  ;;  %p228_p6 = scmp.eq.s32.totalorder %s225_s15, 0 }
   0xa   : > { %p906_p8 = scmp.lt.s32.totalorder %s1073_s10, 2  ;;  %s351_s18 = sand.u32 1, %s1061_s29  }
   0xb   : > { %p1177_p7 = por %p244_p5, %p243_p4  ;;  %s886_s19 = sshll.u32 %s1069_s9, 3 }
   0xc   : > { %s1183_s17 = scalar_select %p228_p6, %s1061_s29, %s230_s13  }
   0xd   : > { %s885_s20 = sshll.u32 %s351_s18, 3  ;;  %s360_s23 = scalar_lea.hbm %s1349_s7, %s886_s19 }
   0xe   : > { %s362_s24 = sshll.u32 %s360_s23, 4  ;;  %s355_s25 = scalar_lea.vmem [#allocation2], %s885_s20  ;;  %s363_s24 = int_to_ptr.hbm [resolvable:$true] %s362_s24 }
   0xf   : > { %s364_s26 = sshll.u32 %s355_s25, 4  ;;  %p903_p9 = pnand %p906_p8, %p1170_p3  ;;  %s365_s26 = int_to_ptr.vmem [resolvable:$true] %s364_s26 }
  0x10   : > { %p887_p10 = scmp.ge.s32.totalorder %s1073_s10, 1  ;;  %p369_p11 = scmp.lt.s32.totalorder %s1073_s10, 3 }
  0x11   : > { %s352_s27 = scalar_lea.sflag [#allocation3], %s351_s18 }
  0x12   : > { %905 = dma.hbm_to_vmem [thread:$0]  (!%p903_p9), %s363_s24, 128, %s365_s26, %s352_s27  }
  0x13   : > { %p370_p12 = pnand %p887_p10, %p369_p11 }
  0x14   : > { %s375_s11 = sand.u32 (!%p370_p12), 1, %s1057_s28  }
  0x15   : > { %373 = sbr.rel (%p370_p12) target bundleno = 611 (0x263), region = 52  ;;  %s1195_s13 = sshll.u32 (!%p370_p12), %s375_s11, 3 }
  0x16   : > { %s376_s15 = scalar_lea.sflag (!%p370_p12), [#allocation3], %s375_s11  ;;  %s379_s19 = scalar_lea.vmem (!%p370_p12), [#allocation2], %s1195_s13 }
  0x1a   : > { %1048 = dma.done.wait (%p1177_p7), %s376_s15, 128  }
  0x1b   : > { %1050 = vsyncadd (%p1177_p7), %s376_s15, 4294967168  ;;  %p448_p13 = scmp.lt.s32.totalorder %s1065_s30, 1  ;;  %v1075_v0 = vmov 0   ;;  %v1076_v1 = vmov 1   ;;  %s1077_s18 = smov 6   ;;  %v1081_v9 = vmov 3  }
  0x1c   : > { %969 = vset.pattern.permute.xlu1 %v1075_v0  ;;  %971 = vset.pattern.permute.xlu0 %v1076_v1  ;;  %s1078_s20 = smov 3   ;;  %s1079_s21 = smov 127   ;;  %v1082_v10 = vmov 2   ;;  %v1083_v11 = vmov 4   ;;  %v1084_v31 = vmov 5   ;;  %v1085_v32 = vmov 6  }
  0x1d   : > { %s1361_s30 = smov (!%p448_p13, %s1065_s30), 1  ;;  %970 = vset.pattern.permute.xlu2 %v1075_v0  ;;  %v1086_v34 = vmov 7   ;;  %v1087_v45 = vmov 8   ;;  %vm705_vm2 = vcmask 64512   ;;  %vm492_vm3 = vcmask 0  }
  0x1e   : > { %s1209_s14 = sshll.u32 %s1361_s30, 3  ;;  %s893_s22 = sshll.u32 %s1361_s30, 2 }
  0x1f   : > { %s451_s16 = scalar_lea.vmem %s1342_s0, %s1209_s14  ;;  %s455_s23 = scalar_lea.vmem %s1343_s1, %s1209_s14 }
  0x20   : > { %s459_s26 = scalar_lea.vmem %s1344_s2, %s1209_s14  ;;  %s463_s15 = scalar_lea.vmem %s1345_s3, %s1209_s14  ;;  %v1227_v3 = vld [vmem:[%s451_s16] sm:$0xff] }
  0x21   : > { %v496_v2 = vld [vmem:[%s459_s26] sm:$0xff]  ;;  %s1080_s16 = smov 126   ;;  %s477_s25 = scalar_lea.vmem %s1347_s5, %s893_s22 }
  0x22   : > { %v1229_v4 = vld [vmem:[%s455_s23] sm:$0xff]  ;;  %636 = vrot.lane.b32.xlu1 %v496_v2, %s1077_s18  ;;  %v515_v5 = vmul.f32 %v496_v2, %v1227_v3  ;;  %574 = vrot.lane.b32.xlu0 %v496_v2, %s1078_s20  ;;  %s470_s11 = scalar_lea.vmem %s1346_s4, %s893_s22  ;;  %s487_s22 = scalar_lea.vmem %s1350_s8, %s1361_s30 }
  0x23   : > { %v497_v6 = vld [vmem:[%s463_s15] sm:$0xff] }
  0x24   : > { %v516_v7 = vmul.f32 %v497_v6, %v1229_v4  ;;  %v1269_v23 = vld [vmem:[%s477_s25] sm:$0x7] }
  0x25   : > { %v1271_v24 = vld [vmem:[%s470_s11] sm:$0x7]  ;;  %v1274_v25 = vperm.slane %v1269_v23, 0  ;;  %v1292_v38 = vperm.slane %v1269_v23, 1 }
  0x26   : > { %v1233_v8 = vsub.f32 %v515_v5, %v516_v7  ;;  %v1277_v26 = vperm.slane %v1271_v24, 0  ;;  %v1295_v39 = vperm.slane %v1271_v24, 1 }
  0x28   : > { %533 = vrot.lane.b32.xlu2 %v1233_v8, %s1079_s21 }
  0x2a   : > { %640 = vrot.lane.b32.xlu1 %v497_v6, %s1077_s18  ;;  %579 = vrot.lane.b32.xlu0 %v497_v6, %s1078_s20  ;;  %s484_s20 = scalar_lea.vmem %s1348_s6, %s1209_s14 }
  0x30   : > { %509 = vperm.xlu2 %970, %v1229_v4  }
  0x32   : > { %551 = vrot.lane.b32.xlu0 %v1233_v8, %s1080_s16  ;;  %502 = vperm.xlu1 %969, %v1227_v3  }
  0x38   : > { %973 = vset.pattern.permute.xlu2 %v1081_v9 }
  0x39   : > { %563 = vperm.xlu2 %973, %v1227_v3  }
  0x3a   : > { %972 = vset.pattern.permute.xlu1 %v1076_v1  ;;  %519 = vperm.xlu0 %971, %v1227_v3   ;;  %v547_v1 = vperm.slane %v1269_v23, 2 }
  0x3b   : > { %525 = vperm.xlu1 %972, %v1229_v4  }
  0x41   : > { %975 = vset.pattern.permute.xlu2 %v1083_v11 }
  0x42   : > { %976 = vset.pattern.permute.xlu0 %v1083_v11 }
  0x43   : > { %974 = vset.pattern.permute.xlu1 %v1081_v9 }
  0x44   : > { %568 = vperm.xlu1 %974, %v1229_v4  }
  0x4c   : > { %977 = vset.pattern.permute.xlu1 %v1082_v10 }
  0x82   : > { %v534_v22 = vpop.permute.xlu2 %533 }
  0x83   : > { %v536_v35 = vadd.f32 %v534_v22, %v1233_v8 }
  0x8a   : > { %v510_v27 = vpop.permute.xlu2 %509 }
  0x8b   : > { %v513_v29 = vmul.f32 %v1274_v25, %v510_v27 }
  0x93   : > { %v564_v47 = vpop.permute.xlu2 %563 }
  0x94   : > { %v637_v12 = vpop.permute.xlu1 %636  ;;  %v575_v13 = vpop.permute.xlu0 %574 }
  0x95   : > { %v577_v14 = vmul.f32 %v575_v13, %v1227_v3  ;;  %v639_v17 = vmul.f32 %v637_v12, %v1227_v3 }
  0x9c   : > { %v641_v15 = vpop.permute.xlu1 %640  ;;  %v580_v16 = vpop.permute.xlu0 %579 }
  0x9d   : > { %v643_v18 = vmul.f32 %v641_v15, %v1229_v4  ;;  %v582_v19 = vmul.f32 %v580_v16, %v1229_v4 }
  0x9f   : > { %v1250_v20 = vsub.f32 %v639_v17, %v643_v18  ;;  %v1252_v21 = vsub.f32 %v577_v14, %v582_v19 }
  0xa1   : > { %613 = vrot.lane.b32.xlu1 %v1252_v21, %s1080_s16  ;;  %674 = vrot.lane.b32.xlu0 %v1250_v20, %s1080_s16 }
  0xa2   : > { %597 = vrot.lane.b32.xlu2 %v1252_v21, %s1079_s21 }
  0xa4   : > { %v503_v28 = vpop.permute.xlu1 %502  ;;  %v552_v36 = vpop.permute.xlu0 %551 }
  0xa5   : > { %v506_v30 = vmul.f32 %v1277_v26, %v503_v28  ;;  %v554_v37 = vadd.f32 %v552_v36, %v536_v35 }
  0xa7   : > { %v514_v33 = vsub.f32 %v506_v30, %v513_v29 }
  0xa9   : > { %538 = vperm.xlu1 %977, %v1227_v3   ;;  %590 = vperm.xlu0 %976, %v1229_v4  }
  0xaa   : > { %658 = vrot.lane.b32.xlu2 %v1250_v20, %s1079_s21 }
  0xac   : > { %v520_v41 = vpop.permute.xlu0 %519 }
  0xad   : > { %v526_v40 = vpop.permute.xlu1 %525  ;;  %v523_v43 = vmul.f32 %v1295_v39, %v520_v41 }
  0xae   : > { %v529_v42 = vmul.f32 %v1292_v38, %v526_v40 }
  0xb0   : > { %v530_v44 = vsub.f32 %v523_v43, %v529_v42 }
  0xb1   : > { %979 = vset.pattern.permute.xlu1 %v1084_v31  ;;  %981 = vset.pattern.permute.xlu0 %v1085_v32 }
  0xb2   : > { %602 = vperm.xlu1 %979, %v1227_v3   ;;  %585 = vperm.xlu2 %975, %v1227_v3   ;;  %v531_v46 = vadd.f32 %v530_v44, %v514_v33 }
  0xb3   : > { %626 = vperm.xlu0 %981, %v1227_v3  }
  0xb6   : > { %v569_v49 = vpop.permute.xlu1 %568 }
  0xba   : > { %982 = vset.pattern.permute.xlu1 %v1085_v32  ;;  %978 = vset.pattern.permute.xlu2 %v1082_v10  ;;  %v571_v10 = vmul.f32 %v569_v49, %v1274_v25 }
  0xbb   : > { %631 = vperm.xlu1 %982, %v1229_v4   ;;  %544 = vperm.xlu2 %978, %v1229_v4  }
  0xbc   : > { %986 = vset.pattern.permute.xlu0 %v1087_v45 }
  0xbd   : > { %668 = vperm.xlu0 %986, %v1229_v4  }
  0xc3   : > { %984 = vset.pattern.permute.xlu1 %v1086_v34  ;;  %980 = vset.pattern.permute.xlu2 %v1084_v31 }
  0xc4   : > { %651 = vperm.xlu1 %984, %v1229_v4   ;;  %607 = vperm.xlu2 %980, %v1229_v4  }
  0xc5   : > { %990 = vset.pattern.permute.xlu0 %v1085_v32 }
  0xcc   : > { %987 = vset.pattern.permute.xlu1 %v1075_v0  ;;  %983 = vset.pattern.permute.xlu2 %v1086_v34  ;;  %v541_v0 = vperm.slane %v1271_v24, 2 }
  0xcd   : > { %557 = vperm.xlu1 %987, %v554_v37   ;;  %646 = vperm.xlu2 %983, %v1227_v3  }
  0xd5   : > { %989 = vset.pattern.permute.xlu1 %v1085_v32  ;;  %985 = vset.pattern.permute.xlu2 %v1087_v45 }
  0xd6   : > { %663 = vperm.xlu2 %985, %v1227_v3  }
  0xde   : > { %988 = vset.pattern.permute.xlu2 %v1081_v9  ;;  %v566_v9 = vmul.f32 %v564_v47, %v1277_v26 }
  0xe0   : > { %v572_v15 = vsub.f32 %v566_v9, %v571_v10 }
  0xfc   : > { %v598_v48 = vpop.permute.xlu2 %597 }
  0xfd   : > { %v600_v51 = vadd.f32 %v598_v48, %v1252_v21 }
 0x104   : > { %v659_v50 = vpop.permute.xlu2 %658 }
 0x105   : > { %v661_v52 = vadd.f32 %v659_v50, %v1250_v20 }
 0x10c   : > { %v586_v57 = vpop.permute.xlu2 %585 }
 0x10d   : > { %v588_v4 = vmul.f32 %v586_v57, %v1295_v39  ;;  %v702_v57 = vld [vmem:[%s379_s19] sm:$0xff] }
 0x113   : > { %v614_v53 = vpop.permute.xlu1 %613  ;;  %v675_v54 = vpop.permute.xlu0 %674 }
 0x114   : > { %v616_v55 = vadd.f32 %v614_v53, %v600_v51  ;;  %v677_v56 = vadd.f32 %v675_v54, %v661_v52 }
 0x115   : > { %v545_v59 = vpop.permute.xlu2 %544 }
 0x116   : > { %619 = vperm.xlu2 %988, %v616_v55   ;;  %680 = vperm.xlu1 %989, %v677_v56   ;;  %v548_v7 = vmul.f32 %v547_v1, %v545_v59  ;;  %v700_v55 = vld [vmem:[%s484_s20] sm:$0xff] }
 0x11b   : > { %v539_v58 = vpop.permute.xlu1 %538  ;;  %v591_v2 = vpop.permute.xlu0 %590 }
 0x11c   : > { %v542_v5 = vmul.f32 %v541_v0, %v539_v58  ;;  %v593_v6 = vmul.f32 %v591_v2, %v1292_v38 }
 0x11e   : > { %v608_v61 = vpop.permute.xlu2 %607  ;;  %v594_v13 = vsub.f32 %v588_v4, %v593_v6  ;;  %v549_v14 = vsub.f32 %v542_v5, %v548_v7 }
 0x11f   : > { %v610_v12 = vmul.f32 %v608_v61, %v547_v1  ;;  %v1088_v61 = vmov 0.0  }
 0x120   : > { %v550_v18 = vadd.f32 %v549_v14, %v531_v46  ;;  %v595_v19 = vadd.f32 %v594_v13, %v572_v15  ;;  %493 = vst.msk [vmem:[%s487_s22] sm:$0x1] %vm492_vm3, %v1088_v61 }
 0x124   : > { %v603_v60 = vpop.permute.xlu1 %602 }
 0x125   : > { %v605_v11 = vmul.f32 %v603_v60, %v541_v0  ;;  %v627_v24 = vpop.permute.xlu0 %626 }
 0x126   : > { %v629_v33 = vmul.f32 %v627_v24, %v1277_v26 }
 0x127   : > { %v647_v63 = vpop.permute.xlu2 %646  ;;  %v611_v16 = vsub.f32 %v605_v11, %v610_v12  ;;  %v704_v5 = vld [vmem:[%s487_s22] sm:$0x1] }
 0x128   : > { %v649_v32 = vmul.f32 %v647_v63, %v1295_v39 }
 0x129   : > { %v612_v21 = vadd.f32 %v611_v16, %v595_v19 }
 0x12d   : > { %v632_v62 = vpop.permute.xlu1 %631 }
 0x12e   : > { %v634_v30 = vmul.f32 %v632_v62, %v1274_v25 }
 0x12f   : > { %v669_v34 = vpop.permute.xlu0 %668 }
 0x130   : > { %v664_v8 = vpop.permute.xlu2 %663  ;;  %v635_v36 = vsub.f32 %v629_v33, %v634_v30  ;;  %v671_v40 = vmul.f32 %v669_v34, %v547_v1 }
 0x131   : > { %v666_v37 = vmul.f32 %v664_v8, %v541_v0 }
 0x133   : > { %v672_v41 = vsub.f32 %v666_v37, %v671_v40 }
 0x136   : > { %v652_v3 = vpop.permute.xlu1 %651 }
 0x137   : > { %v654_v31 = vmul.f32 %v652_v3, %v1292_v38 }
 0x139   : > { %v655_v35 = vsub.f32 %v649_v32, %v654_v31 }
 0x13b   : > { %v656_v42 = vadd.f32 %v655_v35, %v635_v36 }
 0x13d   : > { %v673_v43 = vadd.f32 %v672_v41, %v656_v42 }
 0x13f   : > { %v558_v17 = vpop.permute.xlu1 %557 }
 0x140   : > { %v560_v20 = vsub.f32 %v550_v18, %v558_v17 }
 0x142   : > { %v561_v27 = vmul.f32 %v560_v20, %v560_v20 }
 0x170   : > { %v620_v22 = vpop.permute.xlu2 %619 }
 0x171   : > { %v622_v23 = vsub.f32 %v612_v21, %v620_v22 }
 0x173   : > { %v623_v28 = vmul.f32 %v622_v23, %v622_v23 }
 0x175   : > { %v624_v29 = vadd.f32 %v623_v28, %v561_v27 }
 0x188   : > { %v681_v44 = vpop.permute.xlu1 %680 }
 0x189   : > { %v683_v45 = vsub.f32 %v673_v43, %v681_v44 }
 0x18b   : > { %v684_v46 = vmul.f32 %v683_v45, %v683_v45 }
 0x18d   : > { %v685_v47 = vadd.f32 %v684_v46, %v624_v29 }
 0x18f   : > { %991 = vrsqrt.f32 %v685_v47  ;;  %vm693_vm0 = vcmp.eq.f32.partialorder %v685_v47, inf  ;;  %v696_v51 = vand.u32 2147483648, %v685_v47  ;;  %vm695_vm1 = vcmp.eq.f32.partialorder %v685_v47, 0.0 }
 0x195   : > { %v992_v25 = vpop.eup %991 }
 0x196   : > { %v687_v38 = vmul.f32 %v992_v25, %v685_v47 }
 0x198   : > { %v688_v39 = vmul.f32 %v992_v25, %v687_v38 }
 0x19a   : > { %v689_v48 = vmul.f32 0.5, %v688_v39 }
 0x19c   : > { %v690_v26 = vsub.f32 1.5, %v689_v48 }
 0x19e   : > { %v691_v49 = vmul.f32 %v992_v25, %v690_v26 }
 0x1a0   : > { %v692_v50 = vmul.f32 %v691_v49, %v685_v47 }
 0x1a2   : > { %v694_v52 = vsel %vm693_vm0, %v685_v47, %v692_v50 }
 0x1a3   : > { %v697_v53 = vsel %vm695_vm1, %v696_v51, %v694_v52 }
 0x1a4   : > { %v698_v54 = vmin.f32 %v697_v53, 10.0 }
 0x1a6   : > { %v699_v56 = vmul.f32 0.1, %v698_v54 }
 0x1a8   : > { %v701_v58 = vmul.f32 %v700_v55, %v699_v56 }
 0x1aa   : > { %v703_v59 = vmul.f32 %v702_v57, %v701_v58 }
 0x1ac   : > { %v706_v60 = vsel %vm705_vm2, %v703_v59, 0.0 }
 0x1ad   : > { %707 = vadd.xlane.f32.xlu2 %v706_v60 }
 0x220   : > { %v708_v62 = vpop.xlane.xlu2 %707 }
 0x221   : > { %v709_v63 = vrot.slane %v708_v62, 4 }
 0x223   : > { %v710_v0 = vadd.f32 %v709_v63, %v708_v62 }
 0x225   : > { %v711_v1 = vrot.slane %v710_v0, 2 }
 0x227   : > { %v712_v2 = vadd.f32 %v711_v1, %v710_v0 }
 0x229   : > { %v713_v3 = vrot.slane %v712_v2, 1 }
 0x22b   : > { %v714_v4 = vadd.f32 %v713_v3, %v712_v2 }
 0x22d   : > { %898 = vpush %v714_v4 }
 0x25e   : > { %s899_s13 = spop %898 }
 0x25f   : > { %v716_v6 = vstv %s899_s13 }
 0x260   : > { %v717_v7 = vadd.f32 %v716_v6, %v704_v5 }
 0x262   : > { %719 = vst.msk [vmem:[%s487_s22] sm:$0x1] %vm492_vm3, %v717_v7 }
 0x263 PF: > { %s21_s10 = sadd.s32 1, %s1073_s10   ;;  %s1353_s27 = smov %s1057_s28 }
 0x264   : > { %p18_p0 = scmp.ge.s32.totalorder %s21_s10, 4   ;;  %s1354_s28 = smov %s1061_s29 }
 0x265   : > { %s1355_s29 = smov %s1183_s17  ;;  %s1356_s30 = smov %s1069_s9 }
 0x266   : > { %s1357_s9 = smov %s1359_s12  ;;  %20 = sbr.rel (!%p18_p0) target bundleno = 4 (0x4), region = 117 }
 0x26b   :  { %737 = vsyncpa [#allocation3], 1 }
 0x26c   :  { %739 = vsyncpa [#allocation3 + $0x1], 1 }

</bundles_post_ra>
